<compile_context>
chip_gen: v7x
topology: tpu7x:2x2x1
jax: 0.10.0
libtpu: 0.0.40
codegen_flags: <defaults>
</compile_context>

<pallas_src>
import functools

import jax
import jax.numpy as jnp
from jax.experimental import pallas as pl
from jax.experimental.pallas import tpu as pltpu


def char_rnn_kernel(x_ref, w_ref, out_ref, *, seq_len, b_pad, i_pad, h_pad,
                    o_pad, out_valid):
    """Fused CharRNN forward (single invocation, no grid).

    x_ref:   (S*b_pad, i_pad)  time-major inputs, batch padded to 8 sublanes,
                               input lane-padded to 128, time flattened into rows
    w_ref:   packed weights/biases, one buffer (all row offsets multiple of 8):
               [0       : i_pad        )  W_ih^T  (i_pad, h_pad)
               [i_pad   : i_pad+h_pad  )  W_hh^T  (h_pad, h_pad)
               [i_pad+h_pad            ]  b_ih + b_hh   (1 row)
               [i_pad+h_pad+8 : +h_pad )  W_o^T   (h_pad, o_pad)
               [i_pad+2*h_pad+8        ]  b_o           (1 row)
    out_ref: (b_pad, o_pad)   lane-dense log-softmax output (padded lanes = -inf)
    """
    r_whh = i_pad
    r_b = i_pad + h_pad
    r_wo = i_pad + h_pad + 8
    r_bo = i_pad + 2 * h_pad + 8

    wih_t = w_ref[0:i_pad, 0:h_pad]
    whh_t = w_ref[r_whh:r_whh + h_pad, 0:h_pad]
    bias = w_ref[r_b:r_b + 1, 0:h_pad]
    wo_t = w_ref[r_wo:r_wo + h_pad, 0:o_pad]
    bo = w_ref[r_bo:r_bo + 1, 0:o_pad]

    # Hoisted input projection: one (S*b_pad, i_pad) x (i_pad, h_pad) matmul
    # with the folded bias fused in; independent of h so it stays off the
    # serial critical path.
    x_proj = jnp.dot(x_ref[...], wih_t,
                     preferred_element_type=jnp.float32) + bias  # (S*b_pad, h_pad)

    # Serial recurrence, fully unrolled (seq_len is small and static). The
    # per-step slice offsets are multiples of 8 sublanes -> full-tile reads.
    h = jnp.zeros((b_pad, h_pad), jnp.float32)
    for t in range(seq_len):
        pre = x_proj[t * b_pad:(t + 1) * b_pad, :] + jnp.dot(
            h, whh_t, preferred_element_type=jnp.float32)
        h = jnp.tanh(pre)

    # Final hidden -> output projection; padded output lanes masked to -inf so
    # the (numerically stable) log-softmax max/sum only see the real logits.
    logits = jnp.dot(h, wo_t, preferred_element_type=jnp.float32) + bo
    lane = jax.lax.broadcasted_iota(jnp.int32, (b_pad, o_pad), 1)
    logits = jnp.where(lane < out_valid, logits, -jnp.inf)
    m = jnp.max(logits, axis=1, keepdims=True)
    shifted = logits - m
    lse = jnp.log(jnp.sum(jnp.exp(shifted), axis=1, keepdims=True))
    out_ref[...] = (shifted - lse).astype(out_ref.dtype)


def _round_up(n, m):
    return ((n + m - 1) // m) * m


def char_rnn_forward(line_tensor, w_ih, w_hh, b_ih, b_hh, w_o, b_o):
    """line_tensor: (seq_len, batch, input_size) float32, time-major (nn.RNN default)."""
    S, B, I = line_tensor.shape
    H = w_ih.shape[0]
    O = w_o.shape[0]
    if S == 0:
        raise ValueError("seq_len must be >= 1 (output undefined otherwise)")

    # TODO(synk): for variable-length corpora, bucket/pad S to a few static
    # lengths (with a step-validity mask on h updates) so the unrolled kernel
    # is not recompiled per distinct sequence length; batching many sequences
    # into one call is the largest real-world win at these tiny shapes.
    b_pad = _round_up(B, 8)       # sublane-aligned batch rows
    i_pad = _round_up(I, 128)     # lane-dense dims
    h_pad = _round_up(H, 128)
    o_pad = _round_up(O, 128)

    f32 = jnp.float32

    # Inputs: zero-pad batch -> b_pad and input -> i_pad, flatten time into rows.
    x = jnp.zeros((S, b_pad, i_pad), f32)
    x = x.at[:, :B, :I].set(line_tensor.astype(f32))
    x2 = x.reshape(S * b_pad, i_pad)

    # One packed weight/bias buffer -> single DMA. Zero padding keeps padded
    # hidden lanes exactly 0 through the recurrence (padded weight rows/cols
    # and padded bias lanes are all zero), so the math is exact.
    w_cols = max(h_pad, o_pad)
    rows = i_pad + 2 * h_pad + 16
    w = jnp.zeros((rows, w_cols), f32)
    w = w.at[0:I, 0:H].set(w_ih.T.astype(f32))                                       # W_ih^T
    w = w.at[i_pad:i_pad + H, 0:H].set(w_hh.T.astype(f32))                           # W_hh^T
    w = w.at[i_pad + h_pad, 0:H].set((b_ih + b_hh).astype(f32))                      # folded bias
    w = w.at[i_pad + h_pad + 8:i_pad + h_pad + 8 + H, 0:O].set(w_o.T.astype(f32))    # W_o^T
    w = w.at[i_pad + 2 * h_pad + 8, 0:O].set(b_o.astype(f32))                        # b_o

    kernel = functools.partial(char_rnn_kernel, seq_len=S, b_pad=b_pad,
                               i_pad=i_pad, h_pad=h_pad, o_pad=o_pad,
                               out_valid=O)

    out_pad = pl.pallas_call(
        kernel,
        out_shape=jax.ShapeDtypeStruct((b_pad, o_pad), f32),
        in_specs=[pl.BlockSpec(memory_space=pltpu.MemorySpace.VMEM),
                  pl.BlockSpec(memory_space=pltpu.MemorySpace.VMEM)],
        out_specs=pl.BlockSpec(memory_space=pltpu.MemorySpace.VMEM),
    )(x2, w)

    return out_pad[:B, :O]


def char_rnn_reference(line_tensor, w_ih, w_hh, b_ih, b_hh, w_o, b_o):
    S, B, I = line_tensor.shape
    H = w_ih.shape[0]
    h = jnp.zeros((B, H), jnp.float32)
    for t in range(S):
        h = jnp.tanh(line_tensor[t] @ w_ih.T + b_ih + h @ w_hh.T + b_hh)
    logits = h @ w_o.T + b_o
    return jax.nn.log_softmax(logits, axis=1)


if __name__ == "__main__":
    seq_len, batch = 8, 2
    input_size, hidden_size, output_size = 16, 32, 8

    key = jax.random.PRNGKey(0)
    ks = jax.random.split(key, 7)
    bound = 1.0 / jnp.sqrt(hidden_size)

    line_tensor = jax.random.normal(ks[0], (seq_len, batch, input_size),
                                    dtype=jnp.float32)
    w_ih = jax.random.uniform(ks[1], (hidden_size, input_size),
                              minval=-bound, maxval=bound, dtype=jnp.float32)
    w_hh = jax.random.uniform(ks[2], (hidden_size, hidden_size),
                              minval=-bound, maxval=bound, dtype=jnp.float32)
    b_ih = jax.random.uniform(ks[3], (hidden_size,),
                              minval=-bound, maxval=bound, dtype=jnp.float32)
    b_hh = jax.random.uniform(ks[4], (hidden_size,),
                              minval=-bound, maxval=bound, dtype=jnp.float32)
    w_o = jax.random.uniform(ks[5], (output_size, hidden_size),
                             minval=-bound, maxval=bound, dtype=jnp.float32)
    b_o = jax.random.uniform(ks[6], (output_size,),
                             minval=-bound, maxval=bound, dtype=jnp.float32)

    out = char_rnn_forward(line_tensor, w_ih, w_hh, b_ih, b_hh, w_o, b_o)
    out = jax.block_until_ready(out)

    ref = char_rnn_reference(line_tensor, w_ih, w_hh, b_ih, b_hh, w_o, b_o)
    assert out.shape == (batch, output_size)
    assert jnp.allclose(out, ref, atol=1e-4, rtol=1e-4), "mismatch vs reference"

    print("KERNEL_OK")
</pallas_src>

<mosaic_0001>
module attributes {stable_mosaic.version = 11 : i64} {
  func.func @char_rnn_kernel(%arg0: memref<64x128xf32, #tpu.memory_space<vmem>>, %arg1: memref<400x128xf32, #tpu.memory_space<vmem>>, %arg2: memref<8x128xf32, #tpu.memory_space<vmem>>) attributes {dimension_semantics = [], scalar_prefetch = 0 : i64, scratch_operands = 0 : i64, tpu.core_type = #tpu.core_type<tc>} {
    %c0 = arith.constant 0 : index
    %c0_0 = arith.constant 0 : index
    %0 = vector.load %arg1[%c0, %c0_0] : memref<400x128xf32, #tpu.memory_space<vmem>>, vector<128x128xf32>
    %c128 = arith.constant 128 : index
    %c0_1 = arith.constant 0 : index
    %1 = vector.load %arg1[%c128, %c0_1] : memref<400x128xf32, #tpu.memory_space<vmem>>, vector<128x128xf32>
    %c256 = arith.constant 256 : index
    %c0_2 = arith.constant 0 : index
    %2 = vector.load %arg1[%c256, %c0_2] : memref<400x128xf32, #tpu.memory_space<vmem>>, vector<1x128xf32>
    %c264 = arith.constant 264 : index
    %c0_3 = arith.constant 0 : index
    %3 = vector.load %arg1[%c264, %c0_3] : memref<400x128xf32, #tpu.memory_space<vmem>>, vector<128x128xf32>
    %c392 = arith.constant 392 : index
    %c0_4 = arith.constant 0 : index
    %4 = vector.load %arg1[%c392, %c0_4] : memref<400x128xf32, #tpu.memory_space<vmem>>, vector<1x128xf32>
    %c0_5 = arith.constant 0 : index
    %c0_6 = arith.constant 0 : index
    %5 = vector.load %arg0[%c0_5, %c0_6] : memref<64x128xf32, #tpu.memory_space<vmem>>, vector<64x128xf32>
    %cst = arith.constant dense<0.000000e+00> : vector<64x128xf32>
    %6 = tpu.matmul %5, %0, %cst {dimension_numbers = #tpu.dot_dimension_numbers<[1], [0], [0], [1], [0, 0, 1, 1], [], []>} : vector<64x128xf32>, vector<128x128xf32>, vector<64x128xf32> -> vector<64x128xf32>
    %7 = vector.broadcast %2 : vector<1x128xf32> to vector<64x128xf32>
    %8 = arith.addf %6, %7 : vector<64x128xf32>
    %cst_7 = arith.constant 0.000000e+00 : f32
    %9 = vector.broadcast %cst_7 : f32 to vector<8x128xf32>
    %10 = vector.extract_strided_slice %8 {offsets = [0, 0], sizes = [8, 128], strides = [1, 1]} : vector<64x128xf32> to vector<8x128xf32>
    %cst_8 = arith.constant dense<0.000000e+00> : vector<8x128xf32>
    %11 = tpu.matmul %9, %1, %cst_8 {dimension_numbers = #tpu.dot_dimension_numbers<[1], [0], [0], [1], [0, 0, 1, 1], [], []>} : vector<8x128xf32>, vector<128x128xf32>, vector<8x128xf32> -> vector<8x128xf32>
    %12 = arith.addf %10, %11 : vector<8x128xf32>
    %13 = math.tanh %12 : vector<8x128xf32>
    %14 = vector.extract_strided_slice %8 {offsets = [8, 0], sizes = [8, 128], strides = [1, 1]} : vector<64x128xf32> to vector<8x128xf32>
    %cst_9 = arith.constant dense<0.000000e+00> : vector<8x128xf32>
    %15 = tpu.matmul %13, %1, %cst_9 {dimension_numbers = #tpu.dot_dimension_numbers<[1], [0], [0], [1], [0, 0, 1, 1], [], []>} : vector<8x128xf32>, vector<128x128xf32>, vector<8x128xf32> -> vector<8x128xf32>
    %16 = arith.addf %14, %15 : vector<8x128xf32>
    %17 = math.tanh %16 : vector<8x128xf32>
    %18 = vector.extract_strided_slice %8 {offsets = [16, 0], sizes = [8, 128], strides = [1, 1]} : vector<64x128xf32> to vector<8x128xf32>
    %cst_10 = arith.constant dense<0.000000e+00> : vector<8x128xf32>
    %19 = tpu.matmul %17, %1, %cst_10 {dimension_numbers = #tpu.dot_dimension_numbers<[1], [0], [0], [1], [0, 0, 1, 1], [], []>} : vector<8x128xf32>, vector<128x128xf32>, vector<8x128xf32> -> vector<8x128xf32>
    %20 = arith.addf %18, %19 : vector<8x128xf32>
    %21 = math.tanh %20 : vector<8x128xf32>
    %22 = vector.extract_strided_slice %8 {offsets = [24, 0], sizes = [8, 128], strides = [1, 1]} : vector<64x128xf32> to vector<8x128xf32>
    %cst_11 = arith.constant dense<0.000000e+00> : vector<8x128xf32>
    %23 = tpu.matmul %21, %1, %cst_11 {dimension_numbers = #tpu.dot_dimension_numbers<[1], [0], [0], [1], [0, 0, 1, 1], [], []>} : vector<8x128xf32>, vector<128x128xf32>, vector<8x128xf32> -> vector<8x128xf32>
    %24 = arith.addf %22, %23 : vector<8x128xf32>
    %25 = math.tanh %24 : vector<8x128xf32>
    %26 = vector.extract_strided_slice %8 {offsets = [32, 0], sizes = [8, 128], strides = [1, 1]} : vector<64x128xf32> to vector<8x128xf32>
    %cst_12 = arith.constant dense<0.000000e+00> : vector<8x128xf32>
    %27 = tpu.matmul %25, %1, %cst_12 {dimension_numbers = #tpu.dot_dimension_numbers<[1], [0], [0], [1], [0, 0, 1, 1], [], []>} : vector<8x128xf32>, vector<128x128xf32>, vector<8x128xf32> -> vector<8x128xf32>
    %28 = arith.addf %26, %27 : vector<8x128xf32>
    %29 = math.tanh %28 : vector<8x128xf32>
    %30 = vector.extract_strided_slice %8 {offsets = [40, 0], sizes = [8, 128], strides = [1, 1]} : vector<64x128xf32> to vector<8x128xf32>
    %cst_13 = arith.constant dense<0.000000e+00> : vector<8x128xf32>
    %31 = tpu.matmul %29, %1, %cst_13 {dimension_numbers = #tpu.dot_dimension_numbers<[1], [0], [0], [1], [0, 0, 1, 1], [], []>} : vector<8x128xf32>, vector<128x128xf32>, vector<8x128xf32> -> vector<8x128xf32>
    %32 = arith.addf %30, %31 : vector<8x128xf32>
    %33 = math.tanh %32 : vector<8x128xf32>
    %34 = vector.extract_strided_slice %8 {offsets = [48, 0], sizes = [8, 128], strides = [1, 1]} : vector<64x128xf32> to vector<8x128xf32>
    %cst_14 = arith.constant dense<0.000000e+00> : vector<8x128xf32>
    %35 = tpu.matmul %33, %1, %cst_14 {dimension_numbers = #tpu.dot_dimension_numbers<[1], [0], [0], [1], [0, 0, 1, 1], [], []>} : vector<8x128xf32>, vector<128x128xf32>, vector<8x128xf32> -> vector<8x128xf32>
    %36 = arith.addf %34, %35 : vector<8x128xf32>
    %37 = math.tanh %36 : vector<8x128xf32>
    %38 = vector.extract_strided_slice %8 {offsets = [56, 0], sizes = [8, 128], strides = [1, 1]} : vector<64x128xf32> to vector<8x128xf32>
    %cst_15 = arith.constant dense<0.000000e+00> : vector<8x128xf32>
    %39 = tpu.matmul %37, %1, %cst_15 {dimension_numbers = #tpu.dot_dimension_numbers<[1], [0], [0], [1], [0, 0, 1, 1], [], []>} : vector<8x128xf32>, vector<128x128xf32>, vector<8x128xf32> -> vector<8x128xf32>
    %40 = arith.addf %38, %39 : vector<8x128xf32>
    %41 = math.tanh %40 : vector<8x128xf32>
    %cst_16 = arith.constant dense<0.000000e+00> : vector<8x128xf32>
    %42 = tpu.matmul %41, %3, %cst_16 {dimension_numbers = #tpu.dot_dimension_numbers<[1], [0], [0], [1], [0, 0, 1, 1], [], []>} : vector<8x128xf32>, vector<128x128xf32>, vector<8x128xf32> -> vector<8x128xf32>
    %43 = vector.broadcast %4 : vector<1x128xf32> to vector<8x128xf32>
    %44 = arith.addf %42, %43 : vector<8x128xf32>
    %45 = tpu.iota {dimensions = array<i32: 1>} : vector<8x128xi32>
    %c8_i32 = arith.constant 8 : i32
    %46 = vector.broadcast %c8_i32 : i32 to vector<8x128xi32>
    %47 = arith.cmpi slt, %45, %46 : vector<8x128xi32>
    %cst_17 = arith.constant 0xFF800000 : f32
    %48 = vector.broadcast %cst_17 : f32 to vector<8x128xf32>
    %49 = arith.select %47, %44, %48 : vector<8x128xi1>, vector<8x128xf32>
    %cst_18 = arith.constant dense<0xFF800000> : vector<8xf32>
    %50 = vector.multi_reduction <maximumf>, %49, %cst_18 [1] : vector<8x128xf32> to vector<8xf32>
    %51 = vector.shape_cast %50 : vector<8xf32> to vector<8x1xf32>
    %52 = vector.broadcast %51 : vector<8x1xf32> to vector<8x128xf32>
    %53 = arith.subf %49, %52 : vector<8x128xf32>
    %54 = math.exp %53 : vector<8x128xf32>
    %cst_19 = arith.constant dense<0.000000e+00> : vector<8xf32>
    %55 = vector.multi_reduction <add>, %54, %cst_19 [1] : vector<8x128xf32> to vector<8xf32>
    %56 = vector.shape_cast %55 : vector<8xf32> to vector<8x1xf32>
    %57 = math.log %56 : vector<8x1xf32>
    %58 = vector.broadcast %57 : vector<8x1xf32> to vector<8x128xf32>
    %59 = arith.subf %53, %58 : vector<8x128xf32>
    %c0_20 = arith.constant 0 : index
    %c0_21 = arith.constant 0 : index
    %60 = vector.load %arg2[%c0_20, %c0_21] : memref<8x128xf32, #tpu.memory_space<vmem>>, vector<8x128xf32>
    tpu.vector_store %arg2[%c0_20, %c0_21], %59 {strides = array<i32>} : memref<8x128xf32, #tpu.memory_space<vmem>>, vector<8x128xf32>,
    return
  }
}

</mosaic_0001>

<bundles_post_ra>
// kernel: tpu_custom_call.1
= control target key start
LH: loop header
LB: loop body
LE: loop exit
PB: predicated region body
PF: predicated region fallthrough
CT: control target
= control target key end

     0   :  { %7 = vsyncpa [#allocation3], 0  ;;  %s2026_s0 = inlined_call_operand.hbm [shape: f32[64,128], index: 0, kind: input, shape index: {}]   ;;  %s2027_s1 = inlined_call_operand.hbm [shape: f32[400,128], index: 1, kind: input, shape index: {}]   ;;  %s2028_s2 = inlined_call_operand.hbm [shape: f32[8,128], index: 2, kind: output, shape index: {}]  }
   0x1   :  { %8 = vsyncpa [#allocation6], 0 }
   0x2   :  { %9 = vsyncpa [#allocation4], 0  ;;  %s1774_s9 = smov [#allocation2]   ;;  %s1702_s13 = scalar_lea.hbm %s2026_s0, 1024 }
   0x3   :  { %s15_s10 = sshll.u32 %s1774_s9, 4  ;;  %p1703_p0 = scmp.ne.s32.totalorder %s2026_s0, %s1702_s13  ;;  %s16_s10 = int_to_ptr.vmem [resolvable:$true] %s15_s10 }
   0x4   :  { %p1706_p1 = scmp.lt.u32.totalorder %s1702_s13, %s2026_s0 }
   0x6   :  { %p1708_p2 = pnand %p1706_p1, %p1703_p0 }
   0x8   :  { %1711 = shalt.err (!%p1708_p2)
}
   0x9   :  { %s1712_s18 = scalar_lea.vmem %s16_s10, 1024  ;;  %p1717_p4 = scmp.lt.s32.totalorder %s16_s10, %s16_s10 }
   0xa   :  { %p1713_p3 = scmp.ne.s32.totalorder %s16_s10, %s1712_s18  ;;  %p1718_p5 = scmp.lt.s32.totalorder %s1712_s18, %s1712_s18 }
   0xc   :  { %p1719_p6 = por %p1718_p5, %p1717_p4 }
   0xe   :  { %p1720_p7 = pnand %p1719_p6, %p1713_p3 }
  0x10   :  { %1723 = shalt.err (!%p1720_p7)
}
  0x11   :  { %s1775_s19 = smov 128   ;;  %s1776_s20 = smov 8  }
  0x12   :  { %21 = dma.hbm_to_vmem [thread:$0]  %s2026_s0, 1024, %s16_s10, [#allocation3], %s1775_s19, %s1775_s19, %s1776_s20  }
  0x13   :  { %s1777_s23 = smov [#allocation5]   ;;  %s1724_s27 = scalar_lea.hbm %s2027_s1, 6400 }
  0x14   :  { %s27_s24 = sshll.u32 %s1777_s23, 4  ;;  %p1725_p8 = scmp.ne.s32.totalorder %s2027_s1, %s1724_s27  ;;  %s28_s24 = int_to_ptr.vmem [resolvable:$true] %s27_s24 }
  0x15   :  { %p1728_p9 = scmp.lt.u32.totalorder %s1724_s27, %s2027_s1 }
  0x17   :  { %p1730_p10 = pnand %p1728_p9, %p1725_p8 }
  0x19   :  { %1733 = shalt.err (!%p1730_p10)
}
  0x1a   :  { %s1734_s4 = scalar_lea.vmem %s28_s24, 6400  ;;  %p1739_p12 = scmp.lt.s32.totalorder %s28_s24, %s28_s24 }
  0x1b   :  { %p1735_p11 = scmp.ne.s32.totalorder %s28_s24, %s1734_s4  ;;  %p1740_p13 = scmp.lt.s32.totalorder %s1734_s4, %s1734_s4 }
  0x1d   :  { %p1741_p0 = por %p1740_p13, %p1739_p12 }
  0x1f   :  { %p1742_p1 = pnand %p1741_p0, %p1735_p11 }
  0x21   :  { %1745 = shalt.err (!%p1742_p1)
}
  0x22   :  { %33 = dma.hbm_to_vmem [thread:$0]  %s2027_s1, 6400, %s28_s24, [#allocation6], %s1775_s19, %s1775_s19, %s1776_s20  }
  0x23   :  { %1768 = dma.done.wait [#allocation3], 1024  }
  0x24   :  { %1769 = vsyncadd [#allocation3], 4294966272 }
  0x25   :  { %1770 = dma.done.wait [#allocation6], 6400  }
  0x26   :  { %1771 = vsyncadd [#allocation6], 4294960896  ;;  %v1778_v0 = vmov 0.0|0.0   ;;  %vm1779_vm0 = vmmov 0   ;;  %v1780_v1 = vmov 0.0   ;;  %v40_v2 = vld [vmem:[#allocation5] sm:$0xff] }
  0x27   :  { %1458 = vmatprep.subr.bf16.mxu1 %v1778_v0  ;;  %1143 = vmatprep.mubr.msk.f32.mxu1 %vm1779_vm0, %v1780_v1  ;;  %v41_v3 = vld [vmem:[#allocation5 + $0x8] sm:$0xff]  ;;  %v56_v4 = vld [vmem:[#allocation5 + $0x80] sm:$0xff]  ;;  %v42_v7 = vld [vmem:[#allocation5 + $0x10] sm:$0xff]  ;;  %s1781_s1 = smov [#allocation7]  }
  0x28   :  { %v1426_v5 = vpack.c.bf16 %v41_v3, %v40_v2  ;;  %v57_v6 = vld [vmem:[#allocation5 + $0x88] sm:$0xff]  ;;  %v43_v8 = vld [vmem:[#allocation5 + $0x18] sm:$0xff]  ;;  %v58_v11 = vld [vmem:[#allocation5 + $0x90] sm:$0xff]  ;;  %s878_s6 = sshll.u32 %s1781_s1, 4  ;;  %s879_s6 = int_to_ptr.vmem [resolvable:$true] %s878_s6 }
  0x29   :  { %v1824_v9 = vpack.c.bf16 %v57_v6, %v56_v4  ;;  %v1430_v10 = vpack.c.bf16 %v43_v8, %v42_v7  ;;  %v59_v12 = vld [vmem:[#allocation5 + $0x98] sm:$0xff]  ;;  %v44_v13 = vld [vmem:[#allocation5 + $0x20] sm:$0xff]  ;;  %v45_v14 = vld [vmem:[#allocation5 + $0x28] sm:$0xff]  ;;  %s1746_s7 = scalar_lea.vmem %s879_s6, 128  ;;  %p1751_p3 = scmp.lt.s32.totalorder %s879_s6, %s879_s6 }
  0x2a   :  { %1427 = vmatprep.subr.bf16.mxu0 %v1426_v5  ;;  %v1827_v15 = vpack.c.bf16 %v59_v12, %v58_v11  ;;  %v1434_v16 = vpack.c.bf16 %v45_v14, %v44_v13  ;;  %v60_v17 = vld [vmem:[#allocation5 + $0xa0] sm:$0xff]  ;;  %v61_v18 = vld [vmem:[#allocation5 + $0xa8] sm:$0xff]  ;;  %v46_v19 = vld [vmem:[#allocation5 + $0x30] sm:$0xff]  ;;  %p1747_p2 = scmp.ne.s32.totalorder %s879_s6, %s1746_s7  ;;  %p1752_p4 = scmp.lt.s32.totalorder %s1746_s7, %s1746_s7 }
  0x2b   :  { %1429 = vmatpush3.bf16.msra.mxu0 %v1426_v5  ;;  %1460 = vmatpush3.bf16.msra.mxu1 %v1824_v9  ;;  %v47_v20 = vld [vmem:[#allocation5 + $0x38] sm:$0xff]  ;;  %v1831_v21 = vpack.c.bf16 %v61_v18, %v60_v17  ;;  %v62_v23 = vld [vmem:[#allocation5 + $0xb0] sm:$0xff]  ;;  %v48_v25 = vld [vmem:[#allocation5 + $0x40] sm:$0xff] }
  0x2c   :  { %1431 = vmatprep.subr.bf16.mxu0 %v1430_v10  ;;  %1461 = vmatprep.subr.bf16.mxu1 %v1778_v0  ;;  %v1438_v22 = vpack.c.bf16 %v47_v20, %v46_v19  ;;  %v63_v24 = vld [vmem:[#allocation5 + $0xb8] sm:$0xff]  ;;  %v49_v26 = vld [vmem:[#allocation5 + $0x48] sm:$0xff]  ;;  %v90_v27 = vld [vmem:[#allocation2] sm:$0xff]  ;;  %p1753_p5 = por %p1752_p4, %p1751_p3 }
  0x2d   :  { %1099 = vmatprep.mubr.f32.mxu0 %v90_v27  ;;  %v1835_v28 = vpack.c.bf16 %v63_v24, %v62_v23  ;;  %v1442_v29 = vpack.c.bf16 %v49_v26, %v48_v25  ;;  %v64_v30 = vld [vmem:[#allocation5 + $0xc0] sm:$0xff]  ;;  %v65_v31 = vld [vmem:[#allocation5 + $0xc8] sm:$0xff]  ;;  %v50_v32 = vld [vmem:[#allocation5 + $0x50] sm:$0xff] }
  0x2e   :  { %v51_v33 = vld [vmem:[#allocation5 + $0x58] sm:$0xff]  ;;  %v1839_v34 = vpack.c.bf16 %v65_v31, %v64_v30  ;;  %v66_v36 = vld [vmem:[#allocation5 + $0xd0] sm:$0xff]  ;;  %v52_v38 = vld [vmem:[#allocation5 + $0x60] sm:$0xff]  ;;  %p1754_p6 = pnand %p1753_p5, %p1747_p2 }
  0x2f   :  { %1433 = vmatpush3.bf16.msra.mxu0 %v1430_v10  ;;  %1463 = vmatpush3.bf16.msra.mxu1 %v1827_v15  ;;  %v1446_v35 = vpack.c.bf16 %v51_v33, %v50_v32  ;;  %v67_v37 = vld [vmem:[#allocation5 + $0xd8] sm:$0xff]  ;;  %v53_v39 = vld [vmem:[#allocation5 + $0x68] sm:$0xff]  ;;  %v68_v42 = vld [vmem:[#allocation5 + $0xe0] sm:$0xff] }
  0x30   :  { %1435 = vmatprep.subr.bf16.mxu0 %v1434_v16  ;;  %1464 = vmatprep.subr.bf16.mxu1 %v1778_v0  ;;  %v1843_v40 = vpack.c.bf16 %v67_v37, %v66_v36  ;;  %v1450_v41 = vpack.c.bf16 %v53_v39, %v52_v38  ;;  %v69_v43 = vld [vmem:[#allocation5 + $0xe8] sm:$0xff]  ;;  %v54_v44 = vld [vmem:[#allocation5 + $0x70] sm:$0xff]  ;;  %v55_v45 = vld [vmem:[#allocation5 + $0x78] sm:$0xff] }
  0x31   :  { %v1847_v46 = vpack.c.bf16 %v69_v43, %v68_v42  ;;  %v1454_v47 = vpack.c.bf16 %v55_v45, %v54_v44  ;;  %v70_v48 = vld [vmem:[#allocation5 + $0xf0] sm:$0xff]  ;;  %v71_v49 = vld [vmem:[#allocation5 + $0xf8] sm:$0xff]  ;;  %v91_v51 = vld [vmem:[#allocation2 + $0x8] sm:$0xff] }
  0x32   :  { %v1851_v50 = vpack.c.bf16 %v71_v49, %v70_v48  ;;  %v92_v52 = vld [vmem:[#allocation2 + $0x10] sm:$0xff]  ;;  %v93_v53 = vld [vmem:[#allocation2 + $0x18] sm:$0xff]  ;;  %v94_v54 = vld [vmem:[#allocation2 + $0x20] sm:$0xff] }
  0x33   :  { %1437 = vmatpush3.bf16.msra.mxu0 %v1434_v16  ;;  %1466 = vmatpush3.bf16.msra.mxu1 %v1831_v21  ;;  %v95_v55 = vld [vmem:[#allocation2 + $0x28] sm:$0xff]  ;;  %v96_v56 = vld [vmem:[#allocation2 + $0x30] sm:$0xff]  ;;  %v97_v57 = vld [vmem:[#allocation2 + $0x38] sm:$0xff] }
  0x34   :  { %1439 = vmatprep.subr.bf16.mxu0 %v1438_v22  ;;  %1467 = vmatprep.subr.bf16.mxu1 %v1778_v0  ;;  %v1894_v58 = vld [vmem:[#allocation5 + $0x100] ss:$0 sm:$0xff]  ;;  %v74_v36 = vld [vmem:[#allocation5 + $0x110] sm:$0xff]  ;;  %v75_v37 = vld [vmem:[#allocation5 + $0x118] sm:$0xff] }
  0x35   :  { %v76_v39 = vld [vmem:[#allocation5 + $0x120] sm:$0xff]  ;;  %v78_v42 = vld [vmem:[#allocation5 + $0x130] sm:$0xff]  ;;  %v79_v44 = vld [vmem:[#allocation5 + $0x138] sm:$0xff] }
  0x36   :  { %v80_v45 = vld [vmem:[#allocation5 + $0x140] sm:$0xff] }
  0x37   :  { %1441 = vmatpush3.bf16.msra.mxu0 %v1438_v22  ;;  %1469 = vmatpush3.bf16.msra.mxu1 %v1835_v28 }
  0x38   :  { %1443 = vmatprep.subr.bf16.mxu0 %v1442_v29  ;;  %1470 = vmatprep.subr.bf16.mxu1 %v1778_v0 }
  0x3b   :  { %1445 = vmatpush3.bf16.msra.mxu0 %v1442_v29  ;;  %1472 = vmatpush3.bf16.msra.mxu1 %v1839_v34 }
  0x3c   :  { %1447 = vmatprep.subr.bf16.mxu0 %v1446_v35  ;;  %1473 = vmatprep.subr.bf16.mxu1 %v1778_v0 }
  0x3f   :  { %1449 = vmatpush3.bf16.msra.mxu0 %v1446_v35  ;;  %1475 = vmatpush3.bf16.msra.mxu1 %v1843_v40  ;;  %v73_v35 = vld [vmem:[#allocation5 + $0x108] sm:$0xff] }
  0x40   :  { %1451 = vmatprep.subr.bf16.mxu0 %v1450_v41  ;;  %1476 = vmatprep.subr.bf16.mxu1 %v1778_v0  ;;  %v1651_v38 = vpack.c.bf16 %v74_v36, %v73_v35 }
  0x43   :  { %1453 = vmatpush3.bf16.msra.mxu0 %v1450_v41  ;;  %1478 = vmatpush3.bf16.msra.mxu1 %v1847_v46  ;;  %v77_v41 = vld [vmem:[#allocation5 + $0x128] sm:$0xff] }
  0x44   :  { %1455 = vmatprep.subr.bf16.mxu0 %v1454_v47  ;;  %1479 = vmatprep.subr.bf16.mxu1 %v1778_v0  ;;  %v1657_v43 = vpack.c.bf16 %v78_v42, %v77_v41 }
  0x47   :  { %1457 = vmatpush3.bf16.msra.mxu0 %v1454_v47  ;;  %1481 = vmatpush3.bf16.msra.mxu1 %v1851_v50  ;;  %v82_v47 = vld [vmem:[#allocation5 + $0x150] sm:$0xff] }
  0x48   :  { %1482 = vmatprep.subr.bf16.mxu0 %v1778_v0  ;;  %1506 = vmatprep.subr.bf16.mxu1 %v1778_v0 }
  0x4a   :  { %1100 = vmatmul.mubr.f32.vlgmr.msra.gmra.mrb[0].mxu0 %v91_v51  ;;  %1144 = vmatmul.mubr.f32.vlgmr.msra.gmra.mrb[0].mxu1 %v1780_v1 }
  0x4b   :  { %1484 = vmatpush3.bf16.msra.mxu0 %v1824_v9  ;;  %1508 = vmatpush3.bf16.msra.mxu1 %v1824_v9 }
  0x4c   :  { %1485 = vmatprep.subr.bf16.mxu0 %v1778_v0  ;;  %1509 = vmatprep.subr.bf16.mxu1 %v1778_v0 }
  0x4d   :  { %1213 = vmatprep.mubr.msk.f32.mxu1 %vm1779_vm0, %v1780_v1  ;;  %1102 = vmatprep.mubr.f32.mxu0 %v92_v52 }
  0x4e   :  { %1103 = vmatmul.mubr.f32.gmra.mrb[2].mxu0 %v93_v53 }
  0x4f   :  { %1487 = vmatpush3.bf16.msra.mxu0 %v1827_v15  ;;  %1511 = vmatpush3.bf16.msra.mxu1 %v1827_v15 }
  0x50   :  { %1488 = vmatprep.subr.bf16.mxu0 %v1778_v0  ;;  %1512 = vmatprep.subr.bf16.mxu1 %v1778_v0 }
  0x51   :  { %1105 = vmatprep.mubr.f32.mxu0 %v94_v54  ;;  %v83_v54 = vld [vmem:[#allocation5 + $0x158] sm:$0xff] }
  0x52   :  { %1106 = vmatmul.mubr.f32.gmra.mrb[4].mxu0 %v95_v55  ;;  %v84_v55 = vld [vmem:[#allocation5 + $0x160] sm:$0xff] }
  0x53   :  { %1490 = vmatpush3.bf16.msra.mxu0 %v1831_v21  ;;  %1514 = vmatpush3.bf16.msra.mxu1 %v1831_v21 }
  0x54   :  { %1491 = vmatprep.subr.bf16.mxu0 %v1778_v0  ;;  %1515 = vmatprep.subr.bf16.mxu1 %v1778_v0 }
  0x55   :  { %1108 = vmatprep.mubr.f32.mxu0 %v96_v56  ;;  %v1666_v56 = vpack.c.bf16 %v84_v55, %v83_v54 }
  0x56   :  { %1109 = vmatmul.mubr.f32.gmra.mrb[6].mxu0 %v97_v57  ;;  %v85_v57 = vld [vmem:[#allocation5 + $0x168] sm:$0xff] }
  0x57   :  { %1493 = vmatpush3.bf16.msra.mxu0 %v1835_v28  ;;  %1517 = vmatpush3.bf16.msra.mxu1 %v1835_v28 }
  0x58   :  { %1494 = vmatprep.subr.bf16.mxu0 %v1778_v0  ;;  %1518 = vmatprep.subr.bf16.mxu1 %v1778_v0 }
  0x59   :  { %1178 = vmatprep.mubr.msk.f32.mxu0 %vm1779_vm0, %v1780_v1 }
  0x5b   :  { %1496 = vmatpush3.bf16.msra.mxu0 %v1839_v34  ;;  %1520 = vmatpush3.bf16.msra.mxu1 %v1839_v34 }
  0x5c   :  { %1497 = vmatprep.subr.bf16.mxu0 %v1778_v0  ;;  %1521 = vmatprep.subr.bf16.mxu1 %v1778_v0 }
  0x5f   :  { %1499 = vmatpush3.bf16.msra.mxu0 %v1843_v40  ;;  %1523 = vmatpush3.bf16.msra.mxu1 %v1843_v40 }
  0x60   :  { %1500 = vmatprep.subr.bf16.mxu0 %v1778_v0  ;;  %1524 = vmatprep.subr.bf16.mxu1 %v1778_v0 }
  0x63   :  { %1502 = vmatpush3.bf16.msra.mxu0 %v1847_v46  ;;  %1526 = vmatpush3.bf16.msra.mxu1 %v1847_v46 }
  0x64   :  { %1503 = vmatprep.subr.bf16.mxu0 %v1778_v0  ;;  %1527 = vmatprep.subr.bf16.mxu1 %v1778_v0 }
  0x67   :  { %1505 = vmatpush3.bf16.msra.mxu0 %v1851_v50  ;;  %1529 = vmatpush3.bf16.msra.mxu1 %v1851_v50 }
  0x68   :  { %1530 = vmatprep.subr.bf16.mxu0 %v1778_v0  ;;  %1554 = vmatprep.subr.bf16.mxu1 %v1778_v0 }
 0x11d   :  { %v1101_v59 = vpop.f32.mrb[0].mxu0  ;;  %v273_v60 = vpop.f32.mrb[0].mxu1 }
 0x11e   :  { %v168_v61 = vpop.f32.mrb[1].mxu0  ;;  %v1145_v62 = vpop.f32.mrb[1].mxu1  ;;  %v174_v11 = vadd.f32 %v1101_v59, %v1894_v58  ;;  %v86_v59 = vld [vmem:[#allocation5 + $0x170] sm:$0xff] }
 0x11f   :  { %v169_v63 = vadd.f32 %v1894_v58, %v168_v61  ;;  %v87_v61 = vld [vmem:[#allocation5 + $0x178] sm:$0xff]  ;;  %v88_v62 = vld [vmem:[#allocation5 + $0x180] sm:$0xff] }
 0x121   :  { %v277_v2 = vadd.f32 %v273_v60, %v169_v63  ;;  %v1104_v4 = vpop.f32.mrb[2].mxu0  ;;  %v1669_v60 = vpack.c.bf16 %v86_v59, %v85_v57  ;;  %v1672_v63 = vpack.c.bf16 %v88_v62, %v87_v61 }
 0x122   :  { %v178_v5 = vpop.f32.mrb[3].mxu0  ;;  %v184_v23 = vadd.f32 %v1104_v4, %v1894_v58 }
 0x123   :  { %1682 = vtanh.f32 %v277_v2  ;;  %v179_v17 = vadd.f32 %v1894_v58, %v178_v5 }
 0x125   :  { %v1915_v6 = vpop.f32.mrb[4].mxu0 }
 0x126   :  { %v1917_v7 = vpop.f32.mrb[5].mxu0 }
 0x127   :  { %v189_v29 = vadd.f32 %v1894_v58, %v1917_v7  ;;  %v857_v7 = vlaneseq }
 0x129   :  { %v1919_v8 = vpop.f32.mrb[6].mxu0 }
 0x12a   :  { %v1921_v10 = vpop.f32.mrb[7].mxu0  ;;  %v204_v2 = vadd.f32 %v1919_v8, %v1894_v58 }
 0x12b   :  { %v199_v49 = vadd.f32 %v1894_v58, %v1921_v10  ;;  %v858_v10 = vand.u32 127, %v857_v7 }
 0x12d   :  { %v1683_v3 = vpop.eup %1682  ;;  %vm859_vm1 = vcmp.lt.s32.totalorder %v858_v10, 8 }
 0x12e   :  { %1179 = vmatmul.mubr.f32.vlgmr.msra.gmra.mrb[8].mxu0 %v1683_v3 }
 0x12f   :  { %1532 = vmatpush3.bf16.msra.mxu0 %v1824_v9  ;;  %1248 = vmatprep.mubr.msk.f32.mxu0 %vm1779_vm0, %v1780_v1 }
 0x130   :  { %1533 = vmatprep.subr.bf16.mxu0 %v1778_v0 }
 0x133   :  { %1535 = vmatpush3.bf16.msra.mxu0 %v1827_v15 }
 0x134   :  { %1536 = vmatprep.subr.bf16.mxu0 %v1778_v0 }
 0x137   :  { %1538 = vmatpush3.bf16.msra.mxu0 %v1831_v21 }
 0x138   :  { %1539 = vmatprep.subr.bf16.mxu0 %v1778_v0 }
 0x13b   :  { %1541 = vmatpush3.bf16.msra.mxu0 %v1835_v28 }
 0x13c   :  { %1542 = vmatprep.subr.bf16.mxu0 %v1778_v0 }
 0x13f   :  { %1544 = vmatpush3.bf16.msra.mxu0 %v1839_v34 }
 0x140   :  { %1545 = vmatprep.subr.bf16.mxu0 %v1778_v0 }
 0x143   :  { %1547 = vmatpush3.bf16.msra.mxu0 %v1843_v40 }
 0x144   :  { %1548 = vmatprep.subr.bf16.mxu0 %v1778_v0 }
 0x147   :  { %1550 = vmatpush3.bf16.msra.mxu0 %v1847_v46 }
 0x148   :  { %1551 = vmatprep.subr.bf16.mxu0 %v1778_v0 }
 0x14b   :  { %1553 = vmatpush3.bf16.msra.mxu0 %v1851_v50 }
 0x14c   :  { %1578 = vmatprep.subr.bf16.mxu0 %v1778_v0 }
 0x201   :  { %v345_v12 = vpop.f32.mrb[8].mxu0 }
 0x202   :  { %v349_v13 = vadd.f32 %v345_v12, %v174_v11  ;;  %v1180_v14 = vpop.f32.mrb[9].mxu0  ;;  %v889_v11 = vld [vmem:[#allocation5 + $0x188] ss:$0 sm:$0xff] }
 0x204   :  { %1684 = vtanh.f32 %v349_v13 }
 0x20e   :  { %v1685_v16 = vpop.eup %1684 }
 0x20f   :  { %1214 = vmatmul.mubr.f32.vlgmr.msra.gmra.mrb[2].mxu1 %v1685_v16 }
 0x210   :  { %1556 = vmatpush3.bf16.msra.mxu1 %v1824_v9  ;;  %1283 = vmatprep.mubr.msk.f32.mxu1 %vm1779_vm0, %v1780_v1 }
 0x211   :  { %1557 = vmatprep.subr.bf16.mxu1 %v1778_v0 }
 0x214   :  { %1559 = vmatpush3.bf16.msra.mxu1 %v1827_v15 }
 0x215   :  { %1560 = vmatprep.subr.bf16.mxu1 %v1778_v0 }
 0x218   :  { %1562 = vmatpush3.bf16.msra.mxu1 %v1831_v21 }
 0x219   :  { %1563 = vmatprep.subr.bf16.mxu1 %v1778_v0 }
 0x21c   :  { %1565 = vmatpush3.bf16.msra.mxu1 %v1835_v28 }
 0x21d   :  { %1566 = vmatprep.subr.bf16.mxu1 %v1778_v0 }
 0x220   :  { %1568 = vmatpush3.bf16.msra.mxu1 %v1839_v34 }
 0x221   :  { %1569 = vmatprep.subr.bf16.mxu1 %v1778_v0 }
 0x224   :  { %1571 = vmatpush3.bf16.msra.mxu1 %v1843_v40 }
 0x225   :  { %1572 = vmatprep.subr.bf16.mxu1 %v1778_v0 }
 0x228   :  { %1574 = vmatpush3.bf16.msra.mxu1 %v1847_v46 }
 0x229   :  { %1575 = vmatprep.subr.bf16.mxu1 %v1778_v0 }
 0x22c   :  { %1577 = vmatpush3.bf16.msra.mxu1 %v1851_v50 }
 0x22d   :  { %1602 = vmatprep.subr.bf16.mxu1 %v1778_v0 }
 0x2e2   :  { %v417_v18 = vpop.f32.mrb[2].mxu1 }
 0x2e3   :  { %v421_v19 = vadd.f32 %v417_v18, %v179_v17  ;;  %v1215_v20 = vpop.f32.mrb[3].mxu1 }
 0x2e5   :  { %1686 = vtanh.f32 %v421_v19 }
 0x2ef   :  { %v1687_v22 = vpop.eup %1686 }
 0x2f0   :  { %1249 = vmatmul.mubr.f32.vlgmr.msra.gmra.mrb[10].mxu0 %v1687_v22 }
 0x2f1   :  { %1580 = vmatpush3.bf16.msra.mxu0 %v1824_v9  ;;  %1318 = vmatprep.mubr.msk.f32.mxu0 %vm1779_vm0, %v1780_v1 }
 0x2f2   :  { %1581 = vmatprep.subr.bf16.mxu0 %v1778_v0 }
 0x2f5   :  { %1583 = vmatpush3.bf16.msra.mxu0 %v1827_v15 }
 0x2f6   :  { %1584 = vmatprep.subr.bf16.mxu0 %v1778_v0 }
 0x2f9   :  { %1586 = vmatpush3.bf16.msra.mxu0 %v1831_v21 }
 0x2fa   :  { %1587 = vmatprep.subr.bf16.mxu0 %v1778_v0 }
 0x2fd   :  { %1589 = vmatpush3.bf16.msra.mxu0 %v1835_v28 }
 0x2fe   :  { %1590 = vmatprep.subr.bf16.mxu0 %v1778_v0 }
 0x301   :  { %1592 = vmatpush3.bf16.msra.mxu0 %v1839_v34 }
 0x302   :  { %1593 = vmatprep.subr.bf16.mxu0 %v1778_v0 }
 0x305   :  { %1595 = vmatpush3.bf16.msra.mxu0 %v1843_v40 }
 0x306   :  { %1596 = vmatprep.subr.bf16.mxu0 %v1778_v0 }
 0x309   :  { %1598 = vmatpush3.bf16.msra.mxu0 %v1847_v46 }
 0x30a   :  { %1599 = vmatprep.subr.bf16.mxu0 %v1778_v0 }
 0x30d   :  { %1601 = vmatpush3.bf16.msra.mxu0 %v1851_v50 }
 0x30e   :  { %1626 = vmatprep.subr.bf16.mxu0 %v1778_v0 }
 0x3c3   :  { %v489_v24 = vpop.f32.mrb[10].mxu0 }
 0x3c4   :  { %v493_v25 = vadd.f32 %v489_v24, %v184_v23  ;;  %v1250_v26 = vpop.f32.mrb[11].mxu0 }
 0x3c6   :  { %1688 = vtanh.f32 %v493_v25 }
 0x3d0   :  { %v1689_v27 = vpop.eup %1688 }
 0x3d1   :  { %1284 = vmatmul.mubr.f32.vlgmr.msra.gmra.mrb[4].mxu1 %v1689_v27 }
 0x3d2   :  { %1604 = vmatpush3.bf16.msra.mxu1 %v1824_v9  ;;  %1353 = vmatprep.mubr.msk.f32.mxu1 %vm1779_vm0, %v1780_v1 }
 0x3d3   :  { %1605 = vmatprep.subr.bf16.mxu1 %v1778_v0 }
 0x3d6   :  { %1607 = vmatpush3.bf16.msra.mxu1 %v1827_v15 }
 0x3d7   :  { %1608 = vmatprep.subr.bf16.mxu1 %v1778_v0 }
 0x3da   :  { %1610 = vmatpush3.bf16.msra.mxu1 %v1831_v21 }
 0x3db   :  { %1611 = vmatprep.subr.bf16.mxu1 %v1778_v0 }
 0x3de   :  { %1613 = vmatpush3.bf16.msra.mxu1 %v1835_v28 }
 0x3df   :  { %1614 = vmatprep.subr.bf16.mxu1 %v1778_v0 }
 0x3e2   :  { %1616 = vmatpush3.bf16.msra.mxu1 %v1839_v34 }
 0x3e3   :  { %1617 = vmatprep.subr.bf16.mxu1 %v1778_v0 }
 0x3e6   :  { %1619 = vmatpush3.bf16.msra.mxu1 %v1843_v40 }
 0x3e7   :  { %1620 = vmatprep.subr.bf16.mxu1 %v1778_v0 }
 0x3ea   :  { %1622 = vmatpush3.bf16.msra.mxu1 %v1847_v46 }
 0x3eb   :  { %1623 = vmatprep.subr.bf16.mxu1 %v1778_v0 }
 0x3ee   :  { %1625 = vmatpush3.bf16.msra.mxu1 %v1851_v50 }
 0x3ef   :  { %1650 = vmatprep.subr.bf16.mxu1 %v1778_v0 }
 0x4a4   :  { %v561_v30 = vpop.f32.mrb[4].mxu1 }
 0x4a5   :  { %v565_v31 = vadd.f32 %v561_v30, %v189_v29  ;;  %v1285_v32 = vpop.f32.mrb[5].mxu1 }
 0x4a7   :  { %1690 = vtanh.f32 %v565_v31 }
 0x4b1   :  { %v1691_v33 = vpop.eup %1690 }
 0x4b2   :  { %1319 = vmatmul.mubr.f32.vlgmr.msra.gmra.mrb[12].mxu0 %v1691_v33 }
 0x4b3   :  { %1628 = vmatpush3.bf16.msra.mxu0 %v1824_v9  ;;  %1388 = vmatprep.mubr.msk.f32.mxu0 %vm1779_vm0, %v1780_v1  ;;  %v194_v9 = vadd.f32 %v1915_v6, %v1894_v58 }
 0x4b4   :  { %1629 = vmatprep.subr.bf16.mxu0 %v1778_v0 }
 0x4b7   :  { %1631 = vmatpush3.bf16.msra.mxu0 %v1827_v15 }
 0x4b8   :  { %1632 = vmatprep.subr.bf16.mxu0 %v1778_v0 }
 0x4bb   :  { %1634 = vmatpush3.bf16.msra.mxu0 %v1831_v21 }
 0x4bc   :  { %1635 = vmatprep.subr.bf16.mxu0 %v1778_v0 }
 0x4bf   :  { %1637 = vmatpush3.bf16.msra.mxu0 %v1835_v28 }
 0x4c0   :  { %1638 = vmatprep.subr.bf16.mxu0 %v1778_v0 }
 0x4c3   :  { %1640 = vmatpush3.bf16.msra.mxu0 %v1839_v34 }
 0x4c4   :  { %1641 = vmatprep.subr.bf16.mxu0 %v1778_v0 }
 0x4c7   :  { %1643 = vmatpush3.bf16.msra.mxu0 %v1843_v40  ;;  %v1654_v40 = vpack.c.bf16 %v76_v39, %v75_v37 }
 0x4c8   :  { %1644 = vmatprep.subr.bf16.mxu0 %v1778_v0 }
 0x4cb   :  { %1646 = vmatpush3.bf16.msra.mxu0 %v1847_v46  ;;  %v1660_v46 = vpack.c.bf16 %v80_v45, %v79_v44 }
 0x4cc   :  { %1647 = vmatprep.subr.bf16.mxu0 %v1778_v0 }
 0x4cf   :  { %1649 = vmatpush3.bf16.msra.mxu0 %v1851_v50 }
 0x585   :  { %v633_v15 = vpop.f32.mrb[12].mxu0 }
 0x586   :  { %v637_v21 = vadd.f32 %v633_v15, %v194_v9  ;;  %v1320_v28 = vpop.f32.mrb[13].mxu0 }
 0x588   :  { %1692 = vtanh.f32 %v637_v21 }
 0x592   :  { %v1693_v34 = vpop.eup %1692 }
 0x593   :  { %1354 = vmatmul.mubr.f32.vlgmr.msra.gmra.mrb[6].mxu1 %v1693_v34 }
 0x594   :  { %1423 = vmatprep.mubr.msk.f32.mxu1 %vm1779_vm0, %v1780_v1  ;;  %1652 = vmatpush3.bf16.msra.mxu1 %v1651_v38  ;;  %v81_v1 = vld [vmem:[#allocation5 + $0x148] sm:$0xff] }
 0x595   :  { %1653 = vmatprep.subr.bf16.mxu1 %v1778_v0  ;;  %v1663_v48 = vpack.c.bf16 %v82_v47, %v81_v1 }
 0x598   :  { %1655 = vmatpush3.bf16.msra.mxu1 %v1654_v40 }
 0x599   :  { %1656 = vmatprep.subr.bf16.mxu1 %v1778_v0 }
 0x59c   :  { %1658 = vmatpush3.bf16.msra.mxu1 %v1657_v43 }
 0x59d   :  { %1659 = vmatprep.subr.bf16.mxu1 %v1778_v0 }
 0x5a0   :  { %1661 = vmatpush3.bf16.msra.mxu1 %v1660_v46 }
 0x5a1   :  { %1662 = vmatprep.subr.bf16.mxu1 %v1778_v0 }
 0x5a4   :  { %1664 = vmatpush3.bf16.msra.mxu1 %v1663_v48 }
 0x5a5   :  { %1665 = vmatprep.subr.bf16.mxu1 %v1778_v0 }
 0x5a8   :  { %1667 = vmatpush3.bf16.msra.mxu1 %v1666_v56 }
 0x5a9   :  { %1668 = vmatprep.subr.bf16.mxu1 %v1778_v0 }
 0x5ac   :  { %1670 = vmatpush3.bf16.msra.mxu1 %v1669_v60 }
 0x5ad   :  { %1671 = vmatprep.subr.bf16.mxu1 %v1778_v0 }
 0x5b0   :  { %1673 = vmatpush3.bf16.msra.mxu1 %v1672_v63 }
 0x666   :  { %v705_v50 = vpop.f32.mrb[6].mxu1 }
 0x667   :  { %v709_v51 = vadd.f32 %v705_v50, %v199_v49  ;;  %v1355_v52 = vpop.f32.mrb[7].mxu1 }
 0x669   :  { %1694 = vtanh.f32 %v709_v51 }
 0x673   :  { %v1695_v53 = vpop.eup %1694 }
 0x674   :  { %1389 = vmatmul.mubr.f32.vlgmr.msra.gmra.mrb[14].mxu0 %v1695_v53 }
 0x747   :  { %v777_v3 = vpop.f32.mrb[14].mxu0 }
 0x748   :  { %v781_v4 = vadd.f32 %v777_v3, %v204_v2  ;;  %v1390_v5 = vpop.f32.mrb[15].mxu0 }
 0x74a   :  { %1696 = vtanh.f32 %v781_v4 }
 0x754   :  { %v1697_v6 = vpop.eup %1696 }
 0x755   :  { %1424 = vmatmul.mubr.f32.vlgmr.msra.gmra.mrb[8].mxu1 %v1697_v6 }
 0x828   :  { %v853_v12 = vpop.f32.mrb[8].mxu1 }
 0x829   :  { %v854_v13 = vadd.f32 %v889_v11, %v853_v12  ;;  %v1425_v14 = vpop.f32.mrb[9].mxu1 }
 0x82b   :  { %v860_v16 = vsel %vm859_vm1, %v854_v13, -inf }
 0x82c   :  { %861 = vmax.xlane.f32.xlu0 %v860_v16 }
 0x8b9   :  { %v862_v0 = vpop.xlane.xlu0 %861 }
 0x8ba   :  { %v863_v17 = vsub.f32 %v860_v16, %v862_v0 }
 0x8bc   :  { %v864_v18 = vmul.f32 1.442695, %v863_v17 }
 0x8be   :  { %1698 = vpow2.f32 %v864_v18 }
 0x8c8   :  { %v1699_v58 = vpop.eup %1698 }
 0x8c9   :  { %866 = vadd.xlane.f32.xlu0 %v1699_v58 }
 0x956   :  { %v867_v8 = vpop.xlane.xlu0 %866 }
 0x957   :  { %1700 = vlog2.f32 %v867_v8 }
 0x961   :  { %v1701_v19 = vpop.eup %1700 }
 0x962   :  { %v869_v20 = vmul.f32 0.6931472, %v1701_v19 }
 0x964   :  { %v870_v22 = vsub.f32 %v863_v17, %v869_v20 }
 0x966   :  { %871 = vst [vmem:[#allocation7] sm:$0xff] %v870_v22 }
 0x967   :  { %1757 = shalt.err (!%p1754_p6)
}
 0x968   :  { %s1758_s10 = scalar_lea.hbm %s2028_s2, 128 }
 0x969   :  { %p1759_p7 = scmp.ne.s32.totalorder %s2028_s2, %s1758_s10  ;;  %p1762_p8 = scmp.lt.u32.totalorder %s1758_s10, %s2028_s2 }
 0x96b   :  { %p1764_p9 = pnand %p1762_p8, %p1759_p7 }
 0x96d   :  { %1767 = shalt.err (!%p1764_p9)
}
 0x96e   :  { %881 = dma.vmem_to_hbm [thread:$0]  %s879_s6, 128, %s2028_s2, [#allocation4]  }
 0x96f   :  { %1772 = dma.done.wait [#allocation4], 128  }
 0x970   :  { %1773 = vsyncadd [#allocation4], 4294967168 }
 0x971   :  { %885 = vsyncpa [#allocation3], 1 }
 0x972   :  { %886 = vsyncpa [#allocation6], 1 }
 0x973   :  { %887 = vsyncpa [#allocation4], 1 }

</bundles_post_ra>
